<compile_context>
chip_gen: v7x
topology: tpu7x:2x2x1
jax: 0.10.0
libtpu: 0.0.40
codegen_flags: <defaults>
</compile_context>

<pallas_src>
import math

import jax
import jax.numpy as jnp
from jax import lax
from jax.experimental import pallas as pl
from jax.experimental.pallas import tpu as pltpu

# ----------------------- small config consistent with the module -------------
INPUT_DIM  = 16
D_MODEL    = 32
D_STATE    = 16
D_CONV     = 4
EXPAND     = 2
NUM_LAYERS = 2
NUM_HEADS  = 4            # MHSA heads
MHSA_EVERY = 2
ENABLE_MHSA = True
MAX_LEN    = 64
HEADDIM    = 16           # Mamba2 SSD head dim
D_INNER    = EXPAND * D_MODEL                       # 64
NHEADS_SSD = D_INNER // HEADDIM                     # 4
CONV_DIM   = D_INNER + 2 * D_STATE                  # 96
D_IN_PROJ  = 2 * D_INNER + 2 * D_STATE + NHEADS_SSD # 164

# parameter ordering used for the fused block kernels (wrapper <-> kernel)
MAMBA_PARAMS = ("ln1_g", "ln1_b", "wz", "bz", "wx", "bx", "wB", "bB", "wC", "bC",
                "wdt", "dtb", "conv_wx", "conv_bx", "conv_wB", "conv_bB",
                "conv_wC", "conv_bC", "A_row", "Dp_row", "mnorm_g", "wout", "bout")
MHSA_PARAMS = ("ln2_g", "ln2_b", "wqkv", "bqkv", "wo", "bo")


# ========================= in-kernel helper functions =========================

def _layernorm(x, g, b, eps=1e-5):
    mean = jnp.mean(x, axis=-1, keepdims=True)
    xc = x - mean
    var = jnp.mean(xc * xc, axis=-1, keepdims=True)
    return xc * lax.rsqrt(var + eps) * g + b


def _softplus(x):
    # numerically-stable softplus from ops that lower cleanly in Mosaic
    return jnp.maximum(x, 0.0) + jnp.log(1.0 + jnp.exp(-jnp.abs(x)))


def _conv_silu(x, w, b, shifts):
    # causal depthwise conv: out[t] = sum_k w[k] * x[t + k - (K-1)], x[<0]=0 ; then SiLU.
    # shift-by-d is expressed as a tiny (L,L) matmul (built from iota masks) -> MXU,
    # no sublane roll / pad needed.
    K = w.shape[0]
    acc = b + x * w[K - 1:K, :]
    for d, Sd in enumerate(shifts, start=1):
        acc = acc + jnp.dot(Sd, x, preferred_element_type=jnp.float32) * w[K - 1 - d:K - d, :]
    return acc * jax.nn.sigmoid(acc)


def _mamba_core(h, p):
    """One Mamba2 (SSD) sublayer for a single batch element. h: (L, D_MODEL)."""
    L = h.shape[0]
    f32 = jnp.float32

    u = _layernorm(h, p["ln1_g"], p["ln1_b"])

    # in_proj split into its logical pieces (one matmul each, all VMEM resident)
    z      = jnp.dot(u, p["wz"],  preferred_element_type=f32) + p["bz"]    # (L, DI)
    x_pre  = jnp.dot(u, p["wx"],  preferred_element_type=f32) + p["bx"]    # (L, DI)
    B_pre  = jnp.dot(u, p["wB"],  preferred_element_type=f32) + p["bB"]    # (L, N)
    C_pre  = jnp.dot(u, p["wC"],  preferred_element_type=f32) + p["bC"]    # (L, N)
    dt_raw = jnp.dot(u, p["wdt"], preferred_element_type=f32) + p["dtb"]   # (L, H)

    # iota helpers shared by the conv shifts and the SSD masks
    t_idx = lax.broadcasted_iota(jnp.int32, (L, L), 0)
    s_idx = lax.broadcasted_iota(jnp.int32, (L, L), 1)
    causal = t_idx >= s_idx
    ltri = causal.astype(f32)                     # [s <= t]
    utri = (t_idx <= s_idx).astype(f32)           # rows index r: [r <= s]
    shifts = [(t_idx - s_idx == d).astype(f32) for d in range(1, D_CONV)]

    # causal depthwise conv + SiLU (depthwise => per-slice conv is identical)
    x_in = _conv_silu(x_pre, p["conv_wx"], p["conv_bx"], shifts)           # (L, DI)
    Bt   = _conv_silu(B_pre, p["conv_wB"], p["conv_bB"], shifts)           # (L, N)
    Ct   = _conv_silu(C_pre, p["conv_wC"], p["conv_bC"], shifts)           # (L, N)

    # dt / decay (EUP work, stays in vregs)
    dt  = _softplus(dt_raw)                       # (L, H)   (dt_bias folded into dtb)
    dtA = dt * p["A_row"]                         # (L, H)   log-decay increments (<= 0)
    a_cum = jnp.dot(ltri, dtA, preferred_element_type=f32)   # (L, H) cumulative log-decay

    # shared (L, L) C_t . B_s matrix
    CB = lax.dot_general(Ct, Bt, (((1,), (1,)), ((), ())),
                         preferred_element_type=f32)          # (L, L)

    # quadratic (single-chunk) SSD: y_t = sum_{s<=t} exp(a_t - a_s) (C_t.B_s) dt_s x_s
    ys = []
    for hh in range(NHEADS_SSD):
        a_col  = a_cum[:, hh:hh + 1]                                   # (L, 1): a[t]
        v_col  = dtA[:, hh:hh + 1]                                     # (L, 1)
        dt_col = dt[:, hh:hh + 1]                                      # (L, 1)
        # a[s] as a row via a sublane reduction (transpose-free)
        a_row  = jnp.sum(v_col * utri, axis=0, keepdims=True)          # (1, L)
        expo   = jnp.where(causal, a_col - a_row, -1e30)               # (L, L)
        G      = jnp.exp(expo) * CB                                    # (L, L)
        xh     = x_in[:, hh * HEADDIM:(hh + 1) * HEADDIM]              # (L, P)
        ys.append(jnp.dot(G, dt_col * xh, preferred_element_type=f32)) # (L, P)
    y = jnp.concatenate(ys, axis=-1) + p["Dp_row"] * x_in              # (L, DI) + D skip

    # gated RMSNorm (gate with SiLU(z))
    g = y * (z * jax.nn.sigmoid(z))
    ms = jnp.mean(g * g, axis=-1, keepdims=True)
    yn = g * lax.rsqrt(ms + 1e-5) * p["mnorm_g"]

    return h + jnp.dot(yn, p["wout"], preferred_element_type=f32) + p["bout"]


def _mhsa_core(h, p):
    """Pre-LN multi-head self-attention sublayer for one batch element. h: (L, D)."""
    f32 = jnp.float32
    dh = D_MODEL // NUM_HEADS
    scale = 1.0 / math.sqrt(dh)

    u = _layernorm(h, p["ln2_g"], p["ln2_b"])
    qkv = jnp.dot(u, p["wqkv"], preferred_element_type=f32) + p["bqkv"]    # (L, 3D)

    outs = []
    for hd in range(NUM_HEADS):
        q = qkv[:, hd * dh:(hd + 1) * dh] * scale                          # scale folded into q
        k = qkv[:, D_MODEL + hd * dh:D_MODEL + (hd + 1) * dh]
        v = qkv[:, 2 * D_MODEL + hd * dh:2 * D_MODEL + (hd + 1) * dh]
        s = lax.dot_general(q, k, (((1,), (1,)), ((), ())),
                            preferred_element_type=f32)                    # (L, L)
        m = jnp.max(s, axis=-1, keepdims=True)
        e = jnp.exp(s - m)
        denom = jnp.sum(e, axis=-1, keepdims=True)
        attn = e * pl.reciprocal(denom, approx=True)
        outs.append(jnp.dot(attn, v, preferred_element_type=f32))          # (L, dh)
    o = jnp.concatenate(outs, axis=-1)                                     # (L, D)
    # TODO(synk): reference block definition missing; no causal mask applied (as before).
    return h + jnp.dot(o, p["wo"], preferred_element_type=f32) + p["bo"]


# =============================== Pallas kernels ===============================

def embed_kernel(x_ref, w_ref, b_ref, pos_ref, o_ref):
    o_ref[...] = (jnp.dot(x_ref[...], w_ref[...], preferred_element_type=jnp.float32)
                  + b_ref[...] + pos_ref[...])


def mamba_block_kernel(h_ref, *rest):
    *w_refs, o_ref = rest
    p = {n: r[...] for n, r in zip(MAMBA_PARAMS, w_refs)}
    o_ref[...] = _mamba_core(h_ref[...], p)


def mamba_mhsa_block_kernel(h_ref, *rest):
    *w_refs, o_ref = rest
    p = {n: r[...] for n, r in zip(MAMBA_PARAMS + MHSA_PARAMS, w_refs)}
    h1 = _mamba_core(h_ref[...], p)
    o_ref[...] = _mhsa_core(h1, p)


def head_kernel(h_ref, g_ref, b_ref, dw_ref, db_ref, rw_ref, rb_ref, dir_ref, reg_ref):
    f32 = jnp.float32
    B = h_ref.shape[0]
    g, bb = g_ref[...], b_ref[...]
    dw, db = dw_ref[...], db_ref[...]
    rw, rb = rw_ref[...], rb_ref[...]
    dirs, regs = [], []
    for b in range(B):                                  # B is tiny & static
        x = _layernorm(h_ref[b], g, bb)                 # (L, D)
        pooled = jnp.mean(x, axis=0, keepdims=True)     # (1, D)
        dirs.append(jnp.dot(pooled, dw, preferred_element_type=f32) + db)
        regs.append(jnp.dot(pooled, rw, preferred_element_type=f32) + rb)
    dir_ref[...] = jnp.concatenate(dirs, axis=0)        # single bulk store
    reg_ref[...] = jnp.concatenate(regs, axis=0)


# =============================== kernel wrappers ==============================

def _full_spec(shape):
    zeros = (0,) * len(shape)
    return pl.BlockSpec(shape, lambda b: zeros)


def embed(x, w, b, pos):
    B, L, In = x.shape
    D = w.shape[1]
    return pl.pallas_call(
        embed_kernel,
        out_shape=jax.ShapeDtypeStruct((B, L, D), jnp.float32),
        grid=(B,),
        in_specs=[pl.BlockSpec((None, L, In), lambda i: (i, 0, 0)),
                  _full_spec(w.shape), _full_spec(b.shape), _full_spec(pos.shape)],
        out_specs=pl.BlockSpec((None, L, D), lambda i: (i, 0, 0)),
        compiler_params=pltpu.CompilerParams(dimension_semantics=("parallel",)),
    )(x, w, b, pos)


def run_block(h, bp):
    B, L, D = h.shape
    use_mhsa = bp["use_mhsa"]
    names = MAMBA_PARAMS + (MHSA_PARAMS if use_mhsa else ())
    weights = [bp[n] for n in names]
    kernel = mamba_mhsa_block_kernel if use_mhsa else mamba_block_kernel
    in_specs = [pl.BlockSpec((None, L, D), lambda b: (b, 0, 0))]
    in_specs += [_full_spec(w.shape) for w in weights]
    return pl.pallas_call(
        kernel,
        out_shape=jax.ShapeDtypeStruct((B, L, D), jnp.float32),
        grid=(B,),
        in_specs=in_specs,
        out_specs=pl.BlockSpec((None, L, D), lambda b: (b, 0, 0)),
        compiler_params=pltpu.CompilerParams(dimension_semantics=("parallel",)),
    )(h, *weights)


def heads_fused(h, params):
    B = h.shape[0]
    return pl.pallas_call(
        head_kernel,
        out_shape=(jax.ShapeDtypeStruct((B, 3), jnp.float32),
                   jax.ShapeDtypeStruct((B, 3), jnp.float32)),
    )(h, params["norm_g"], params["norm_b"],
      params["dir_w"], params["dir_b"], params["reg_w"], params["reg_b"])


# =============================== model forward ================================

def forward(x, params):
    B, L, _ = x.shape
    pos = params["pos_emb"][0, :L, :]                              # (L, D)
    h = embed(x, params["in_w"], params["in_b"], pos)              # (B, L, D)
    for bp in params["blocks"]:
        h = run_block(h, bp)
    # heads(): dropout (identity in eval) of LN(h), mean over L, two linear heads
    dir_logits, reg_out = heads_fused(h, params)
    return dir_logits, reg_out


# =============================== parameter init ===============================

def _xavier(key, fan_in, fan_out):
    a = math.sqrt(6.0 / (fan_in + fan_out))
    return jax.random.uniform(key, (fan_in, fan_out), jnp.float32, -a, a)


def init_params(key):
    keys = iter(jax.random.split(key, 64))
    p = {}
    p["in_w"] = _xavier(next(keys), INPUT_DIM, D_MODEL)
    p["in_b"] = jnp.zeros((1, D_MODEL), jnp.float32)
    p["pos_emb"] = jax.random.normal(next(keys), (1, MAX_LEN, D_MODEL), jnp.float32)

    DI, N, H = D_INNER, D_STATE, NHEADS_SSD
    blocks = []
    for i in range(NUM_LAYERS):
        use_mhsa = ENABLE_MHSA and (i % MHSA_EVERY == MHSA_EVERY - 1)
        bp = {"use_mhsa": use_mhsa}
        bp["ln1_g"] = jnp.ones((1, D_MODEL), jnp.float32)
        bp["ln1_b"] = jnp.zeros((1, D_MODEL), jnp.float32)

        W = _xavier(next(keys), D_MODEL, D_IN_PROJ)       # full in_proj, then split
        bp["wz"]  = W[:, :DI]
        bp["wx"]  = W[:, DI:2 * DI]
        bp["wB"]  = W[:, 2 * DI:2 * DI + N]
        bp["wC"]  = W[:, 2 * DI + N:2 * DI + 2 * N]
        bp["wdt"] = W[:, 2 * DI + 2 * N:]
        bp["bz"] = jnp.zeros((1, DI), jnp.float32)
        bp["bx"] = jnp.zeros((1, DI), jnp.float32)
        bp["bB"] = jnp.zeros((1, N), jnp.float32)
        bp["bC"] = jnp.zeros((1, N), jnp.float32)
        dt_bias = jnp.log(jnp.expm1(jnp.full((1, H), 0.01, jnp.float32)))
        bp["dtb"] = jnp.zeros((1, H), jnp.float32) + dt_bias   # in_proj dt bias (0) + dt_bias

        bound = math.sqrt(1.0 / D_CONV)
        conv_w = jax.random.uniform(next(keys), (D_CONV, CONV_DIM), jnp.float32, -bound, bound)
        bp["conv_wx"] = conv_w[:, :DI]
        bp["conv_wB"] = conv_w[:, DI:DI + N]
        bp["conv_wC"] = conv_w[:, DI + N:]
        bp["conv_bx"] = jnp.zeros((1, DI), jnp.float32)
        bp["conv_bB"] = jnp.zeros((1, N), jnp.float32)
        bp["conv_bC"] = jnp.zeros((1, N), jnp.float32)

        A_log = jnp.log(jnp.arange(1, H + 1, dtype=jnp.float32))
        bp["A_row"]  = (-jnp.exp(A_log)).reshape(1, H)
        bp["Dp_row"] = jnp.repeat(jnp.ones((H,), jnp.float32), HEADDIM).reshape(1, DI)
        bp["mnorm_g"] = jnp.ones((1, DI), jnp.float32)
        bp["wout"] = _xavier(next(keys), DI, D_MODEL)
        bp["bout"] = jnp.zeros((1, D_MODEL), jnp.float32)

        if use_mhsa:
            bp["ln2_g"] = jnp.ones((1, D_MODEL), jnp.float32)
            bp["ln2_b"] = jnp.zeros((1, D_MODEL), jnp.float32)
            wq = _xavier(next(keys), D_MODEL, D_MODEL)
            wk = _xavier(next(keys), D_MODEL, D_MODEL)
            wv = _xavier(next(keys), D_MODEL, D_MODEL)
            bp["wqkv"] = jnp.concatenate([wq, wk, wv], axis=1)
            bp["bqkv"] = jnp.zeros((1, 3 * D_MODEL), jnp.float32)
            bp["wo"] = _xavier(next(keys), D_MODEL, D_MODEL)
            bp["bo"] = jnp.zeros((1, D_MODEL), jnp.float32)
        blocks.append(bp)
    p["blocks"] = blocks

    p["norm_g"] = jnp.ones((1, D_MODEL), jnp.float32)
    p["norm_b"] = jnp.zeros((1, D_MODEL), jnp.float32)
    p["dir_w"] = _xavier(next(keys), D_MODEL, 3)
    p["dir_b"] = jnp.zeros((1, 3), jnp.float32)
    p["reg_w"] = _xavier(next(keys), D_MODEL, 3)
    p["reg_b"] = jnp.zeros((1, 3), jnp.float32)
    return p


# ==================================== main ====================================

if __name__ == "__main__":
    root = jax.random.PRNGKey(0)
    xkey, pkey = jax.random.split(root)
    B, L = 2, 8
    x = jax.random.normal(xkey, (B, L, INPUT_DIM), jnp.float32)
    params = init_params(pkey)

    dir_logits, reg_out = forward(x, params)
    jax.block_until_ready((dir_logits, reg_out))

    assert dir_logits.shape == (B, 3), dir_logits.shape
    assert reg_out.shape == (B, 3), reg_out.shape
    assert bool(jnp.all(jnp.isfinite(dir_logits))) and bool(jnp.all(jnp.isfinite(reg_out)))
    print("KERNEL_OK")
</pallas_src>

<mosaic_0001>
module attributes {stable_mosaic.version = 11 : i64} {
  func.func @embed_kernel(%arg0: i32, %arg1: memref<1x8x16xf32, #tpu.memory_space<vmem>>, %arg2: memref<16x32xf32, #tpu.memory_space<vmem>>, %arg3: memref<1x32xf32, #tpu.memory_space<vmem>>, %arg4: memref<8x32xf32, #tpu.memory_space<vmem>>, %arg5: memref<1x8x32xf32, #tpu.memory_space<vmem>>) attributes {dimension_semantics = [#tpu.dimension_semantics<parallel>], iteration_bounds = array<i64: 2>, scalar_prefetch = 0 : i64, scratch_operands = 0 : i64, tpu.core_type = #tpu.core_type<tc>, window_params = [{transform_indices = @transform_0, window_bounds = array<i64: 1, 8, 16>}, {pipeline_mode = #tpu.pipeline_mode<synchronous>, transform_indices = @transform_1, window_bounds = array<i64: 16, 32>}, {pipeline_mode = #tpu.pipeline_mode<synchronous>, transform_indices = @transform_2, window_bounds = array<i64: 1, 32>}, {pipeline_mode = #tpu.pipeline_mode<synchronous>, transform_indices = @transform_3, window_bounds = array<i64: 8, 32>}, {transform_indices = @transform_4, window_bounds = array<i64: 1, 8, 32>}]} {
    %c0 = arith.constant 0 : index
    %c0_0 = arith.constant 0 : index
    %c0_1 = arith.constant 0 : index
    %0 = vector.load %arg1[%c0, %c0_0, %c0_1] : memref<1x8x16xf32, #tpu.memory_space<vmem>>, vector<1x8x16xf32>
    %1 = vector.shape_cast %0 : vector<1x8x16xf32> to vector<8x16xf32>
    %c0_2 = arith.constant 0 : index
    %c0_3 = arith.constant 0 : index
    %2 = vector.load %arg2[%c0_2, %c0_3] : memref<16x32xf32, #tpu.memory_space<vmem>>, vector<16x32xf32>
    %cst = arith.constant dense<0.000000e+00> : vector<8x32xf32>
    %3 = tpu.matmul %1, %2, %cst {dimension_numbers = #tpu.dot_dimension_numbers<[1], [0], [0], [1], [0, 0, 1, 1], [], []>} : vector<8x16xf32>, vector<16x32xf32>, vector<8x32xf32> -> vector<8x32xf32>
    %c0_4 = arith.constant 0 : index
    %c0_5 = arith.constant 0 : index
    %4 = vector.load %arg3[%c0_4, %c0_5] : memref<1x32xf32, #tpu.memory_space<vmem>>, vector<1x32xf32>
    %5 = vector.broadcast %4 : vector<1x32xf32> to vector<8x32xf32>
    %6 = arith.addf %3, %5 : vector<8x32xf32>
    %c0_6 = arith.constant 0 : index
    %c0_7 = arith.constant 0 : index
    %7 = vector.load %arg4[%c0_6, %c0_7] : memref<8x32xf32, #tpu.memory_space<vmem>>, vector<8x32xf32>
    %8 = arith.addf %6, %7 : vector<8x32xf32>
    %c0_8 = arith.constant 0 : index
    %c0_9 = arith.constant 0 : index
    %c0_10 = arith.constant 0 : index
    %9 = vector.load %arg5[%c0_8, %c0_9, %c0_10] : memref<1x8x32xf32, #tpu.memory_space<vmem>>, vector<1x8x32xf32>
    %10 = vector.shape_cast %9 : vector<1x8x32xf32> to vector<8x32xf32>
    %11 = vector.shape_cast %8 : vector<8x32xf32> to vector<1x8x32xf32>
    tpu.vector_store %arg5[%c0_8, %c0_9, %c0_10], %11 {strides = array<i32>} : memref<1x8x32xf32, #tpu.memory_space<vmem>>, vector<1x8x32xf32>,
    return
  }
  func.func @transform_0(%arg0: i32) -> (i32, i32, i32) {
    %c0_i32 = arith.constant 0 : i32
    %c0_i32_0 = arith.constant 0 : i32
    %c0_i32_1 = arith.constant 0 : i32
    return %arg0, %c0_i32, %c0_i32_0 : i32, i32, i32
  }
  func.func @transform_1(%arg0: i32) -> (i32, i32) {
    %c0_i32 = arith.constant 0 : i32
    %c0_i32_0 = arith.constant 0 : i32
    %c0_i32_1 = arith.constant 0 : i32
    return %c0_i32, %c0_i32_0 : i32, i32
  }
  func.func @transform_2(%arg0: i32) -> (i32, i32) {
    %c0_i32 = arith.constant 0 : i32
    %c0_i32_0 = arith.constant 0 : i32
    %c0_i32_1 = arith.constant 0 : i32
    return %c0_i32, %c0_i32_0 : i32, i32
  }
  func.func @transform_3(%arg0: i32) -> (i32, i32) {
    %c0_i32 = arith.constant 0 : i32
    %c0_i32_0 = arith.constant 0 : i32
    %c0_i32_1 = arith.constant 0 : i32
    return %c0_i32, %c0_i32_0 : i32, i32
  }
  func.func @transform_4(%arg0: i32) -> (i32, i32, i32) {
    %c0_i32 = arith.constant 0 : i32
    %c0_i32_0 = arith.constant 0 : i32
    %c0_i32_1 = arith.constant 0 : i32
    return %arg0, %c0_i32, %c0_i32_0 : i32, i32, i32
  }
}

</mosaic_0001>

<bundles_post_ra>
// kernel: tpu_custom_call.1
= control target key start
LH: loop header
LB: loop body
LE: loop exit
PB: predicated region body
PF: predicated region fallthrough
CT: control target
= control target key end

     0   :  { %9 = vsyncpa [#allocation3], 0  ;;  %s866_s0 = inlined_call_operand.hbm [shape: f32[2,8,16], index: 0, kind: input, shape index: {}]   ;;  %s867_s1 = inlined_call_operand.hbm [shape: f32[16,32], index: 1, kind: input, shape index: {}]   ;;  %s868_s2 = inlined_call_operand.vmem [shape: f32[1,32], index: 2, kind: input, shape index: {}]   ;;  %s869_s3 = inlined_call_operand.vmem [shape: f32[8,32], index: 3, kind: input, shape index: {}]   ;;  %s870_s4 = inlined_call_operand.hbm [shape: f32[2,8,32], index: 4, kind: output, shape index: {}]  }
   0x1   :  { %11 = vsyncpa [#allocation3 + $0x1], 0 }
   0x2   :  { %12 = vsyncpa [#allocation6], 0 }
   0x3   :  { %13 = vsyncpa [#allocation4], 0 }
   0x4   :  { %15 = vsyncpa [#allocation4 + $0x1], 0  ;;  %s664_s15 = smov 0   ;;  %s666_s16 = smov 0  }
   0x5   :  { %s668_s17 = smov 0   ;;  %s670_s18 = smov 0  }
   0x6 LB: > { %s685_s19 = sadd.s32 4294967295, %s629_s18   ;;  %s410_s20 = sadd.s32 4294967294, %s629_s18   ;;  %s629_s18 = sphi %s670_s18, %s890_s18   ;;  %s625_s17 = sphi %s668_s17, %s889_s17   ;;  %s621_s16 = sphi %s666_s16, %s888_s16   ;;  %s617_s15 = sphi %s664_s15, %s887_s15  }
   0x7   : > { %p41_p0 = scmp.ne.s32.totalorder %s621_s16, %s617_s15  ;;  %p871_p1 = scmp.eq.s32.totalorder %s685_s19, 0 }
   0x8   : > { %p134_p3 = scmp.eq.s32.totalorder %s410_s20, 1  ;;  %p411_p5 = scmp.ge.s32.totalorder %s629_s18, 1 }
   0x9   : > { %p694_p4 = por %p871_p1, %p41_p0  ;;  %p141_p7 = scmp.lt.s32.totalorder %s629_s18, 3 }
   0xa   : > { %p699_p6 = por %p134_p3, %p41_p0  ;;  %s631_s24 = smov [#allocation5]  }
   0xb   : > { %s874_s21 = scalar_select %p694_p4, 1, 0 }
   0xc   : > { %s875_s22 = scalar_select %p699_p6, 1, 0 }
   0xd   : > { %p704_p8 = pnand %p411_p5, %p141_p7  ;;  %s153_s25 = sshll.u32 %s631_s24, 4  ;;  %s708_s25 = int_to_ptr.vmem [resolvable:$true] %s153_s25 }
   0xe   : > { %s720_s27 = sadd.s32 1, %s629_s18   ;;  %s28_s28 = sadd.s32 1, %s625_s17 }
   0xf   : > { %s876_s23 = scalar_select %p704_p8, 1, 0 }
  0x10   : > { %p447_p9 = pneg %p704_p8  ;;  %s25_s29 = ssub.s32 %s629_s18, %s720_s27 }
  0x11   : > { %s501_s6 = scalar_lea.hbm %s867_s1, 256 }
  0x12   : > { %p715_p11 = pnand %p447_p9, %p871_p1  ;;  %p502_p12 = scmp.ne.s32.totalorder %s867_s1, %s501_s6 }
  0x13   : > { %p508_p5 = scmp.lt.u32.totalorder %s501_s6, %s867_s1 }
  0x14   : > { %p503_p13 = pneg %p715_p11 }
  0x16   : > { %p504_p0 = pnand %p503_p13, %p502_p12 }
  0x18   : > { %p505_p3 = pneg %p504_p0 }
  0x1a   : > { %p510_p7 = pnand %p508_p5, %p505_p3 }
  0x1c   : > { %513 = shalt.err (!%p510_p7)
}
  0x1d   : > { %s514_s11 = scalar_lea.vmem %s708_s25, 256  ;;  %p522_p2 = scmp.lt.s32.totalorder %s708_s25, %s708_s25 }
  0x1e   : > { %p515_p9 = scmp.ne.s32.totalorder %s708_s25, %s514_s11  ;;  %p523_p6 = scmp.lt.s32.totalorder %s514_s11, %s514_s11 }
  0x20   : > { %p517_p10 = pnand %p515_p9, %p503_p13  ;;  %p524_p4 = por %p523_p6, %p522_p2 }
  0x22   : > { %p518_p1 = pneg %p517_p10 }
  0x24   : > { %p525_p8 = pnand %p524_p4, %p518_p1 }
  0x26   : > { %528 = shalt.err (!%p525_p8)
}
  0x27   : > { %s632_s12 = smov 128   ;;  %s633_s13 = smov 8  }
  0x28   : > { %450 = dma.hbm_to_vmem [thread:$0]  (!%p715_p11), %s867_s1, 256, %s708_s25, [#allocation6], %s632_s12, %s632_s12, %s633_s13  }
  0x29   : > { %p26_p2 = scmp.eq.s32.totalorder %s25_s29, 0  ;;  %p35_p1 = scmp.ne.s32.totalorder %s625_s17, %s621_s16 }
  0x2a   : > { %p36_p4 = scmp.eq.s32.totalorder %s629_s18, 0  ;;  %p460_p6 = scmp.lt.s32.totalorder %s629_s18, 2 }
  0x2b   : > { %s751_s24 = scalar_select %p26_p2, %s625_s17, %s28_s28  }
  0x2c   : > { %p37_p8 = por %p36_p4, %p35_p1  ;;  %p878_p10 = scmp.eq.s32.totalorder %s685_s19, 1 }
  0x2d   : > { %s173_s5 = sand.u32 1, %s625_s17   ;;  %s415_s6 = sshll.u32 %s629_s18, 7 }
  0x2e   : > { %p755_p12 = por %p878_p10, %p35_p1  ;;  %s414_s7 = sshll.u32 %s173_s5, 3 }
  0x2f   : > { %s764_s9 = scalar_lea.hbm %s866_s0, %s415_s6  ;;  %s177_s25 = scalar_lea.vmem [#allocation2], %s414_s7 }
  0x30   : > { %s184_s28 = sshll.u32 %s177_s25, 4  ;;  %p766_p11 = pnand %p460_p6, %p37_p8  ;;  %s770_s28 = int_to_ptr.vmem [resolvable:$true] %s184_s28 }
  0x31   : > { %s174_s10 = scalar_lea.sflag [#allocation3], %s173_s5  ;;  %s529_s11 = scalar_lea.hbm %s764_s9, 128 }
  0x32   : > { %p530_p13 = scmp.ne.s32.totalorder %s764_s9, %s529_s11  ;;  %p531_p0 = pneg %p766_p11 }
  0x33   : > { %s534_s14 = scalar_lea.hbm %s866_s0, 256  ;;  %p535_p7 = scmp.lt.u32.totalorder %s764_s9, %s866_s0 }
  0x34   : > { %p532_p3 = pnand %p531_p0, %p530_p13  ;;  %p536_p9 = scmp.lt.u32.totalorder %s534_s14, %s529_s11 }
  0x35   : > { %p538_p1 = scmp.lt.u32.totalorder %s529_s11, %s764_s9 }
  0x36   : > { %p533_p5 = pneg %p532_p3  ;;  %p537_p2 = por %p536_p9, %p535_p7 }
  0x38   : > { %p539_p4 = por %p538_p1, %p537_p2 }
  0x3a   : > { %p540_p6 = pnand %p539_p4, %p533_p5 }
  0x3c   : > { %543 = shalt.err (!%p540_p6)
}
  0x3d   : > { %s544_s5 = scalar_lea.vmem %s770_s28, 128  ;;  %s634_s7 = smov [#allocation2]  }
  0x3e   : > { %p545_p8 = scmp.ne.s32.totalorder %s770_s28, %s544_s5  ;;  %s549_s26 = sshll.u32 %s634_s7, 4  ;;  %s550_s26 = int_to_ptr.vmem [resolvable:$false] %s549_s26 }
  0x3f   : > { %s551_s8 = scalar_lea.vmem %s550_s26, 256  ;;  %p552_p3 = scmp.lt.s32.totalorder %s770_s28, %s550_s26 }
  0x40   : > { %p547_p10 = pnand %p545_p8, %p531_p0  ;;  %p553_p7 = scmp.lt.s32.totalorder %s551_s8, %s544_s5 }
  0x42   : > { %p548_p13 = pneg %p547_p10  ;;  %p554_p9 = por %p553_p7, %p552_p3 }
  0x44   : > { %p555_p2 = pnand %p554_p9, %p548_p13 }
  0x46   : > { %558 = shalt.err (!%p555_p2)
}
  0x47   : > { %454 = dma.hbm_to_vmem [thread:$0]  (!%p766_p11), %s764_s9, 128, %s770_s28, %s174_s10  }
  0x48   : > { %p881_p5 = scmp.ne.s32.totalorder %s876_s23, 0 }
  0x49   : > { %s800_s25 = sand.u32 (!%p881_p5), 1, %s621_s16   ;;  %p882_p0 = scmp.ne.s32.totalorder (!%p881_p5), %s874_s21, 0 }
  0x4a   : > { %193 = sbr.rel (%p881_p5) target bundleno = 321 (0x141), region = 36  ;;  %s417_s11 = sshll.u32 (!%p881_p5), %s800_s25, 3 }
  0x4b   : > { %s196_s12 = scalar_lea.sflag (!%p881_p5), [#allocation3], %s800_s25  ;;  %s199_s13 = scalar_lea.vmem (!%p881_p5), [#allocation2], %s417_s11 }
  0x51   : > { %604 = dma.done.wait (%p882_p0), %s196_s12, 128  }
  0x52   : > { %606 = vsyncadd (%p882_p0), %s196_s12, 4294967168  ;;  %p883_p1 = scmp.eq.s32.totalorder %s685_s19, 0 }
  0x54   : > { %608 = dma.done.wait (%p883_p1), [#allocation6], 256   ;;  %p884_p11 = pmov %p883_p1 }
  0x55   : > { %v635_v0 = vmov 0.0|0.0   ;;  %vm636_vm0 = vmmov 0   ;;  %v637_v1 = vmov 0.0   ;;  %v229_v2 = vld [vmem:[#allocation5] sm:$0xff]  ;;  %v230_v3 = vld [vmem:[#allocation5 + $0x8] sm:$0xff]  ;;  %v228_v5 = vld [vmem:[%s199_s13] sm:$0xff] }
  0x56   : > { %610 = vsyncadd (%p884_p11), [#allocation6], 4294967040  ;;  %436 = vmatprep.subr.bf16.mxu0 %v635_v0  ;;  %433 = vmatprep.mubr.msk.f32.mxu0 %vm636_vm0, %v637_v1  ;;  %v437_v4 = vpack.c.bf16 %v230_v3, %v229_v2  ;;  %vm238_vm1 = vcmask 130048   ;;  %v420_v6 = vld [vmem:[%s868_s2] ss:$0 sm:$0xff]  ;;  %s423_s29 = sshll.u32 %s685_s19, 7 }
  0x57   : > { %v312_v8 = vld [vmem:[%s869_s3] sm:$0xff]  ;;  %s227_s10 = scalar_lea.vmem [#allocation7], %s417_s11  ;;  %vm314_vm2 = vcmask 261120   ;;  %s822_s5 = scalar_lea.hbm %s870_s4, %s423_s29 }
  0x58   : > { %438 = vmatpush3.bf16.msra.mxu0 %v437_v4  ;;  %s330_s14 = sshll.u32 %s227_s10, 4  ;;  %s317_s7 = scalar_lea.sflag [#allocation4], %s800_s25  ;;  %s824_s14 = int_to_ptr.vmem [resolvable:$true] %s330_s14 }
  0x59   : > { %s559_s26 = scalar_lea.vmem %s824_s14, 128  ;;  %s638_s19 = smov [#allocation7]  }
  0x5a   : > { %p560_p4 = scmp.ne.s32.totalorder %s824_s14, %s559_s26  ;;  %s563_s8 = sshll.u32 %s638_s19, 4  ;;  %s564_s8 = int_to_ptr.vmem [resolvable:$false] %s563_s8 }
  0x5b   : > { %434 = vmatmul.mubr.msk.f32.vlgmr.msra.gmra.mrb[0].mxu0 %vm238_vm1, %v228_v5  ;;  %s565_s11 = scalar_lea.vmem %s564_s8, 256  ;;  %p566_p10 = scmp.lt.s32.totalorder %s824_s14, %s564_s8 }
  0x5c   : > { %p561_p6 = pnand %p560_p4, %p755_p12  ;;  %p567_p13 = scmp.lt.s32.totalorder %s565_s11, %s559_s26 }
  0x5e   : > { %p562_p8 = pneg %p561_p6  ;;  %p568_p3 = por %p567_p13, %p566_p10 }
  0x60   : > { %p569_p7 = pnand %p568_p3, %p562_p8 }
 0x12e   : > { %v308_v7 = vpop.f32.mrb[0].mxu0 }
 0x12f   : > { %v309_v9 = vadd.f32 %v420_v6, %v308_v7  ;;  %v435_v10 = vpop.f32.mrb[1].mxu0 }
 0x131   : > { %v313_v11 = vadd.f32 %v312_v8, %v309_v9 }
 0x133   : > { %315 = vst.msk [vmem:[%s227_s10] sm:$0xff] %vm314_vm2, %v313_v11 }
 0x134   : > { %572 = shalt.err (!%p569_p7)
}
 0x135   : > { %s573_s25 = scalar_lea.hbm %s822_s5, 128  ;;  %s577_s21 = scalar_lea.hbm %s870_s4, 256 }
 0x136   : > { %p574_p9 = scmp.ne.s32.totalorder %s822_s5, %s573_s25  ;;  %p578_p0 = scmp.lt.u32.totalorder %s822_s5, %s870_s4 }
 0x137   : > { %p579_p1 = scmp.lt.u32.totalorder %s577_s21, %s573_s25  ;;  %p581_p4 = scmp.lt.u32.totalorder %s573_s25, %s822_s5 }
 0x138   : > { %p575_p2 = pnand %p574_p9, %p755_p12 }
 0x139   : > { %p580_p11 = por %p579_p1, %p578_p0 }
 0x13a   : > { %p576_p5 = pneg %p575_p2 }
 0x13b   : > { %p582_p6 = por %p581_p4, %p580_p11 }
 0x13d   : > { %p583_p8 = pnand %p582_p6, %p576_p5 }
 0x13f   : > { %586 = shalt.err (!%p583_p8)
}
 0x140   : > { %445 = dma.vmem_to_hbm [thread:$0]  (%p755_p12), %s824_s14, 128, %s822_s5, %s317_s7  }
 0x141 PF: > { %s342_s28 = sand.u32 1, %s617_s15   ;;  %p885_p10 = scmp.ne.s32.totalorder %s875_s22, 0 }
 0x142   : > { %p886_p13 = scmp.ge.s32.totalorder %s629_s18, 2  ;;  %s343_s29 = scalar_lea.sflag [#allocation4], %s342_s28 }
 0x144   : > { %p456_p3 = pnand %p886_p13, %p885_p10 }
 0x146   : > { %612 = dma.done.wait (!%p456_p3), %s343_s29, 128  }
 0x147   : > { %614 = vsyncadd (!%p456_p3), %s343_s29, 4294967168  ;;  %p18_p7 = scmp.ge.s32.totalorder %s720_s27, 4   ;;  %s887_s15 = smov %s621_s16 }
 0x148   : > { %s888_s16 = smov %s625_s17  ;;  %s889_s17 = smov %s751_s24 }
 0x149   : > { %s890_s18 = smov %s720_s27  ;;  %20 = sbr.rel (!%p18_p7) target bundleno = 6 (0x6), region = 85 }
 0x150   :  { %348 = vsyncpa [#allocation3], 1 }
 0x151   :  { %350 = vsyncpa [#allocation3 + $0x1], 1 }
 0x152   :  { %351 = vsyncpa [#allocation6], 1 }
 0x153   :  { %352 = vsyncpa [#allocation4], 1 }
 0x154   :  { %354 = vsyncpa [#allocation4 + $0x1], 1 }

</bundles_post_ra>
